<compile_context>
chip_gen: v5e
topology: v5e:2x2
jax: 0.10.0
libtpu: 0.0.40
codegen_flags: <defaults>
</compile_context>

<pallas_src>
from functools import partial

import jax
import jax.numpy as jnp
from jax.experimental import pallas as pl
from jax.experimental.pallas import tpu as pltpu


def _make_freqmask_kernel(F, num_masks, replace_with_zero):
    """Build a kernel specialized on (F, num_masks, replace_with_zero)."""

    def kernel(params_ref, x_ref, o_ref):
        # params_ref: SMEM int32[num_masks, 2] = [f_mask_begin, f_mask_end) per mask.
        x = x_ref[...].astype(jnp.float32)               # (C_TILE, F, T)
        n_elems = x.shape[1] * x.shape[2]
        inv_n = jnp.float32(1.0 / n_elems)

        # Mel-bin index, built once at (1, F, 1); broadcast over C and T in the
        # select instead of materializing a full-tile iota/mask.
        rows = jax.lax.broadcasted_iota(jnp.int32, (1, F, 1), 1)

        for m in range(num_masks):                       # num_masks is small & static
            begin = params_ref[m, 0]
            end = params_ref[m, 1]
            mask = (rows >= begin) & (rows < end)        # (1, F, 1); empty if begin==end
            if replace_with_zero:
                x = jnp.where(mask, jnp.float32(0.0), x)
            else:
                # Per-channel mean of the CURRENT (already partially masked)
                # data — matches the sequential in-place PyTorch loop.
                row_sum = jnp.sum(x, axis=2, keepdims=True)       # (C_TILE, F, 1)
                ch_mean = jnp.sum(row_sum, axis=1, keepdims=True) * inv_n  # (C_TILE, 1, 1)
                x = jnp.where(mask, ch_mean, x)

        o_ref[...] = x.astype(o_ref.dtype)

    return kernel


def _apply_freq_masks(x, params, *, replace_with_zero,
                      target_block_bytes=2 * 1024 * 1024):
    """Apply all masks in `params` ((num_masks, 2) int32 [begin, end)) in one pass."""
    C, F, T = x.shape
    num_masks = params.shape[0]

    # Tile channels together so each block is ~target_block_bytes (amortizes the
    # ~0.35us per-grid-step overhead; the tiny demo collapses to a single block).
    per_channel_bytes = F * T * x.dtype.itemsize
    c_tile = max(1, min(C, target_block_bytes // max(per_channel_bytes, 1)))
    grid = (pl.cdiv(C, c_tile),)

    kernel = _make_freqmask_kernel(F, num_masks, bool(replace_with_zero))

    return pl.pallas_call(
        kernel,
        out_shape=jax.ShapeDtypeStruct((C, F, T), x.dtype),
        grid_spec=pltpu.PrefetchScalarGridSpec(
            num_scalar_prefetch=1,
            grid=grid,
            in_specs=[pl.BlockSpec((c_tile, F, T), lambda c, p: (c, 0, 0))],
            out_specs=pl.BlockSpec((c_tile, F, T), lambda c, p: (c, 0, 0)),
        ),
        # In-place semantics (PyTorch masked_fill_): alias x (flat input index 1,
        # after the scalar-prefetch params at index 0) to the output.
        input_output_aliases={1: 0},
        compiler_params=pltpu.CompilerParams(
            dimension_semantics=("parallel",),
            vmem_limit_bytes=32 * 1024 * 1024,
        ),
    )(params, x)


def _draw_mask_params(key, num_mels, max_mask_size_F, num_masks):
    """Traced equivalent of the module's random draws.

    Returns (num_masks, 2) int32 [begin, end).  The PyTorch early-return
    (size >= num_mels or size == 0 aborts this AND all later masks) is encoded
    by setting begin == end == 0 for every aborted mask (a no-op in the kernel).
    """
    begins, ends = [], []
    aborted = jnp.asarray(False)
    for _ in range(num_masks):
        key, k_size, k_begin, k_end = jax.random.split(key, 4)
        # random.randrange(0, max_mask_size_F)
        size = jax.random.randint(k_size, (), 0, max_mask_size_F, dtype=jnp.int32)
        aborted = aborted | (size >= num_mels) | (size == 0)
        # random.randrange(0, num_mels - size)   (span clamped when aborted)
        begin = jax.random.randint(
            k_begin, (), 0, jnp.maximum(num_mels - size, 1), dtype=jnp.int32)
        # random.randrange(begin, begin + size)  (span clamped when aborted)
        end = jax.random.randint(
            k_end, (), begin, jnp.maximum(begin + size, begin + 1), dtype=jnp.int32)
        active = jnp.logical_not(aborted)
        begins.append(jnp.where(active, begin, 0))
        ends.append(jnp.where(active, end, 0))
    return jnp.stack([jnp.stack(begins), jnp.stack(ends)], axis=-1).astype(jnp.int32)


@partial(jax.jit, static_argnames=("max_mask_size_F", "num_masks", "replace_with_zero"))
def freq_mask(x, key, *, max_mask_size_F=20, num_masks=1, replace_with_zero=False):
    """JAX/Pallas equivalent of FreqMask.forward.  x: (C, F, T) float."""
    if num_masks <= 0:
        return x
    _, F, _ = x.shape
    params = _draw_mask_params(key, F, max_mask_size_F, num_masks)
    return _apply_freq_masks(x, params, replace_with_zero=replace_with_zero)


if __name__ == "__main__":
    key = jax.random.PRNGKey(0)
    k_data, k_mask = jax.random.split(key)

    C, F, T = 4, 32, 128
    x = jax.random.normal(k_data, (C, F, T), dtype=jnp.float32)

    # --- Randomized, fully-jitted path (module defaults; like the PyTorch
    #     module it may leave the input unchanged for some random draws). ---
    y = jax.block_until_ready(
        freq_mask(x, k_mask, max_mask_size_F=20, num_masks=1,
                  replace_with_zero=False))
    assert y.shape == x.shape and y.dtype == x.dtype

    # --- Deterministic checks against a pure-JAX reference of the PyTorch
    #     semantics (mean recomputed after each mask). ---
    rows = jnp.arange(F)[None, :, None]

    def ref_apply(xr, mask_list, zero_fill):
        for b, e in mask_list:
            m = (rows >= b) & (rows < e)
            if zero_fill:
                xr = jnp.where(m, 0.0, xr)
            else:
                ch_mean = jnp.mean(xr, axis=(1, 2), keepdims=True)
                xr = jnp.where(m, ch_mean, xr)
        return xr

    # Single mask, mean fill and zero fill.
    p1 = jnp.array([[5, 13]], dtype=jnp.int32)
    out_mean = jax.block_until_ready(_apply_freq_masks(x, p1, replace_with_zero=False))
    out_zero = jax.block_until_ready(_apply_freq_masks(x, p1, replace_with_zero=True))
    assert jnp.allclose(out_mean, ref_apply(x, [(5, 13)], False), atol=1e-5, rtol=1e-5)
    assert jnp.allclose(out_zero, ref_apply(x, [(5, 13)], True), atol=1e-5, rtol=1e-5)

    # Two masks fused into a single pallas_call; second mask's fill uses the
    # mean of the already-masked tensor (sequential semantics).
    p2 = jnp.array([[5, 13], [20, 28]], dtype=jnp.int32)
    out_two = jax.block_until_ready(_apply_freq_masks(x, p2, replace_with_zero=False))
    assert jnp.allclose(out_two, ref_apply(x, [(5, 13), (20, 28)], False),
                        atol=1e-5, rtol=1e-5)

    print("KERNEL_OK")
</pallas_src>

<mosaic_0001>
module attributes {stable_mosaic.version = 11 : i64} {
  func.func @kernel(%arg0: i32, %arg1: memref<1x2xi32, #tpu.memory_space<smem>>, %arg2: memref<4x32x128xf32, #tpu.memory_space<vmem>>, %arg3: memref<4x32x128xf32, #tpu.memory_space<vmem>>) attributes {dimension_semantics = [#tpu.dimension_semantics<parallel>], iteration_bounds = array<i64: 1>, scalar_prefetch = 1 : i64, scratch_operands = 0 : i64, tpu.core_type = #tpu.core_type<tc>, window_params = [{transform_indices = @transform_0, window_bounds = array<i64: 4, 32, 128>}, {transform_indices = @transform_1, window_bounds = array<i64: 4, 32, 128>}]} {
    %c0 = arith.constant 0 : index
    %c0_0 = arith.constant 0 : index
    %c0_1 = arith.constant 0 : index
    %0 = vector.load %arg2[%c0, %c0_0, %c0_1] : memref<4x32x128xf32, #tpu.memory_space<vmem>>, vector<4x32x128xf32>
    %1 = tpu.iota {dimensions = array<i32: 1>} : vector<1x32x1xi32>
    %c0_2 = arith.constant 0 : index
    %c0_3 = arith.constant 0 : index
    %2 = memref.load %arg1[%c0_2, %c0_3] : memref<1x2xi32, #tpu.memory_space<smem>>
    %c0_4 = arith.constant 0 : index
    %c1 = arith.constant 1 : index
    %3 = memref.load %arg1[%c0_4, %c1] : memref<1x2xi32, #tpu.memory_space<smem>>
    %4 = vector.broadcast %2 : i32 to vector<1x32x1xi32>
    %5 = arith.cmpi sge, %1, %4 : vector<1x32x1xi32>
    %6 = vector.broadcast %3 : i32 to vector<1x32x1xi32>
    %7 = arith.cmpi slt, %1, %6 : vector<1x32x1xi32>
    %8 = arith.andi %5, %7 : vector<1x32x1xi1>
    %cst = arith.constant dense<0.000000e+00> : vector<4x32xf32>
    %9 = vector.multi_reduction <add>, %0, %cst [2] : vector<4x32x128xf32> to vector<4x32xf32>
    %10 = vector.shape_cast %9 : vector<4x32xf32> to vector<4x32x1xf32>
    %cst_5 = arith.constant dense<0.000000e+00> : vector<4x1xf32>
    %11 = vector.multi_reduction <add>, %10, %cst_5 [1] : vector<4x32x1xf32> to vector<4x1xf32>
    %12 = vector.shape_cast %11 : vector<4x1xf32> to vector<4x1x1xf32>
    %cst_6 = arith.constant 2.44140625E-4 : f32
    %13 = vector.broadcast %cst_6 : f32 to vector<4x1x1xf32>
    %14 = arith.mulf %12, %13 : vector<4x1x1xf32>
    %15 = vector.shape_cast %8 : vector<1x32x1xi1> to vector<1x32x1xi1>
    %16 = vector.broadcast %15 : vector<1x32x1xi1> to vector<4x32x128xi1>
    %17 = vector.shape_cast %14 : vector<4x1x1xf32> to vector<4x1x1xf32>
    %18 = vector.broadcast %17 : vector<4x1x1xf32> to vector<4x32x128xf32>
    %19 = arith.select %16, %18, %0 : vector<4x32x128xi1>, vector<4x32x128xf32>
    %c0_7 = arith.constant 0 : index
    %c0_8 = arith.constant 0 : index
    %c0_9 = arith.constant 0 : index
    %20 = vector.load %arg3[%c0_7, %c0_8, %c0_9] : memref<4x32x128xf32, #tpu.memory_space<vmem>>, vector<4x32x128xf32>
    tpu.vector_store %arg3[%c0_7, %c0_8, %c0_9], %19 {strides = array<i32>} : memref<4x32x128xf32, #tpu.memory_space<vmem>>, vector<4x32x128xf32>,
    return
  }
  func.func @transform_0(%arg0: i32, %arg1: memref<1x2xi32, #tpu.memory_space<smem>>) -> (i32, i32, i32) {
    %c0_i32 = arith.constant 0 : i32
    %c0_i32_0 = arith.constant 0 : i32
    %c0_i32_1 = arith.constant 0 : i32
    return %arg0, %c0_i32, %c0_i32_0 : i32, i32, i32
  }
  func.func @transform_1(%arg0: i32, %arg1: memref<1x2xi32, #tpu.memory_space<smem>>) -> (i32, i32, i32) {
    %c0_i32 = arith.constant 0 : i32
    %c0_i32_0 = arith.constant 0 : i32
    %c0_i32_1 = arith.constant 0 : i32
    return %arg0, %c0_i32, %c0_i32_0 : i32, i32, i32
  }
}

</mosaic_0001>

<bundles_post_ra>
// kernel: freq_mask.1
= control target key start
LH: loop header
LB: loop body
LE: loop exit
PB: predicated region body
PF: predicated region fallthrough
CT: control target
= control target key end

     0   :  { %s274_s12 = smov [#allocation3]   ;;  %s422_s0 = inlined_call_operand.vmem [shape: s32[1,2], index: 0, kind: input, shape index: {}]   ;;  %s423_s1 = inlined_call_operand.hbm [shape: f32[4,32,128], index: 1, kind: input, shape index: {}, may-alias: {1,2}]   ;;  %s424_s2 = inlined_call_operand.hbm [shape: f32[4,32,128], index: 2, kind: output, shape index: {}, may-alias: {1,2}]  }
   0x1   :  { %s8_s11 = sshll.u32 %s422_s0, 4  ;;  %s9_s11 = int_to_ptr.vmem [resolvable:$true] %s8_s11 }
   0x2   :  { %11 = dma.vmem_to_smem %s9_s11, 16, %s274_s12, [#allocation2] }
   0x3   :  { %268 = dma.done.wait [#allocation2], 16 }
   0x4   :  { %269 = vsyncadd [#allocation2], 4294967280 }
   0x5   :  { %14 = sfence }
   0x6   :  { %15 = vsyncpa [#allocation5], 0 }
   0x7   :  { %16 = vsyncpa [#allocation6], 0  ;;  %s21_s15 = sshll.u32 %s423_s1, 4  ;;  %s275_s16 = smov [#allocation4]   ;;  %s22_s15 = int_to_ptr.hbm [resolvable:$true] %s21_s15 }
   0x8   :  { %s23_s17 = sshll.u32 %s275_s16, 4  ;;  %s276_s18 = smov 128   ;;  %s24_s17 = int_to_ptr.vmem [resolvable:$true] %s23_s17 }
   0x9   :  { %s277_s19 = smov 8  }
   0xa   :  { %29 = dma.hbm_to_vmem [thread:$0]  %s22_s15, 2048, %s24_s17, [#allocation5], %s276_s18, %s276_s18, %s277_s19  }
   0xb   :  { %270 = dma.done.wait [#allocation5], 2048  }
   0xc   :  { %271 = vsyncadd [#allocation5], 4294965248  ;;  %v303_v0 = vld [vmem:[#allocation4 + $0x40] sm:$0xff]  ;;  %v312_v3 = vld [vmem:[#allocation4 + $0x48] sm:$0xff]  ;;  %s55_s0 = sld [smem:[#allocation3]]  ;;  %v50_v31 = vlaneseq  ;;  %s278_s20 = smov [#allocation7]  }
   0xd   :  { %v305_v1 = vld [vmem:[#allocation4 + $0x20] sm:$0xff]  ;;  %87 = vadd.xlane.f32.xlu2 %v303_v0  ;;  %v314_v4 = vld [vmem:[#allocation4 + $0x28] sm:$0xff]  ;;  %v323_v7 = vld [vmem:[#allocation4 + $0x10] sm:$0xff]  ;;  %s202_s1 = sld [smem:[#allocation3 + $0x1]]  ;;  %s187_s21 = sshll.u32 %s278_s20, 4  ;;  %s188_s21 = int_to_ptr.vmem [resolvable:$true] %s187_s21 }
   0xe   :  { %v307_v2 = vld [vmem:[#allocation4] sm:$0xff]  ;;  %79 = vadd.xlane.f32.xlu1 %v305_v1  ;;  %v316_v5 = vld [vmem:[#allocation4 + $0x8] sm:$0xff]  ;;  %v330_v9 = vld [vmem:[#allocation4 + $0x50] sm:$0xff]  ;;  %v51_v40 = vshrl.u32 %v50_v31, 7  ;;  %s189_s24 = sshll.u32 %s424_s2, 4  ;;  %s190_s24 = int_to_ptr.hbm [resolvable:$true] %s189_s24 }
   0xf   :  { %71 = vadd.xlane.f32.xlu0 %v307_v2  ;;  %v321_v6 = vld [vmem:[#allocation4 + $0x68] sm:$0xff]  ;;  %v325_v8 = vld [vmem:[#allocation4 + $0x60] sm:$0xff]  ;;  %v332_v10 = vld [vmem:[#allocation4 + $0x70] sm:$0xff] }
  0x10   :  { %v334_v11 = vld [vmem:[#allocation4 + $0x30] sm:$0xff]  ;;  %v339_v12 = vld [vmem:[#allocation4 + $0x38] sm:$0xff]  ;;  %v52_v49 = vadd.s32 8, %v51_v40  ;;  %v53_v52 = vadd.s32 16, %v51_v40  ;;  %v54_v56 = vadd.s32 24, %v51_v40 }
  0x11   :  { %v341_v13 = vld [vmem:[#allocation4 + $0x58] sm:$0xff] }
  0x12   :  { %v343_v14 = vld [vmem:[#allocation4 + $0x18] sm:$0xff]  ;;  %v57_v45 = vstv %s55_s0 }
  0x13   :  { %v348_v15 = vld [vmem:[#allocation4 + $0x78] sm:$0xff]  ;;  %v62_v50 = vstv %s202_s1  ;;  %vm58_vm0 = vcmp.ge.s32.totalorder %v51_v40, %v57_v45  ;;  %vm59_vm2 = vcmp.ge.s32.totalorder %v52_v49, %v57_v45  ;;  %vm60_vm4 = vcmp.ge.s32.totalorder %v53_v52, %v57_v45 }
  0x14   :  { %vm63_vm1 = vcmp.lt.s32.totalorder %v51_v40, %v62_v50  ;;  %vm64_vm3 = vcmp.lt.s32.totalorder %v52_v49, %v62_v50  ;;  %vm65_vm5 = vcmp.lt.s32.totalorder %v53_v52, %v62_v50  ;;  %vm61_vm6 = vcmp.ge.s32.totalorder %v54_v56, %v57_v45 }
  0x15   :  { %89 = vadd.xlane.f32.xlu2 %v312_v3  ;;  %vm66_vm7 = vcmp.lt.s32.totalorder %v54_v56, %v62_v50  ;;  %vm352_vm8 = vmand %vm58_vm0, %vm63_vm1 }
  0x16   :  { %81 = vadd.xlane.f32.xlu1 %v314_v4  ;;  %vm356_vm9 = vmand %vm59_vm2, %vm64_vm3 }
  0x17   :  { %73 = vadd.xlane.f32.xlu0 %v316_v5  ;;  %vm360_vm10 = vmand %vm60_vm4, %vm65_vm5 }
  0x18   :  { %vm364_vm11 = vmand %vm61_vm6, %vm66_vm7 }
  0x1d   :  { %75 = vadd.xlane.f32.xlu2 %v323_v7 }
  0x1e   :  { %97 = vadd.xlane.f32.xlu1 %v321_v6 }
  0x1f   :  { %95 = vadd.xlane.f32.xlu0 %v325_v8 }
  0x25   :  { %99 = vadd.xlane.f32.xlu2 %v332_v10 }
  0x26   :  { %91 = vadd.xlane.f32.xlu1 %v330_v9 }
  0x27   :  { %83 = vadd.xlane.f32.xlu0 %v334_v11 }
  0x2d   :  { %93 = vadd.xlane.f32.xlu2 %v341_v13 }
  0x2e   :  { %85 = vadd.xlane.f32.xlu1 %v339_v12 }
  0x2f   :  { %77 = vadd.xlane.f32.xlu0 %v343_v14 }
  0x37   :  { %101 = vadd.xlane.f32.xlu0 %v348_v15 }
  0x80   :  { %v88_v16 = vpop.xlane.xlu2 %87 }
  0x81   :  { %v80_v17 = vpop.xlane.xlu1 %79 }
  0x82   :  { %v72_v18 = vpop.xlane.xlu0 %71 }
  0x88   :  { %v90_v19 = vpop.xlane.xlu2 %89 }
  0x89   :  { %v82_v20 = vpop.xlane.xlu1 %81  ;;  %v121_v28 = vadd.f32 %v90_v19, %v88_v16 }
  0x8a   :  { %v74_v21 = vpop.xlane.xlu0 %73  ;;  %v112_v29 = vadd.f32 %v82_v20, %v80_v17 }
  0x8b   :  { %v103_v30 = vadd.f32 %v74_v21, %v72_v18 }
  0x90   :  { %v76_v23 = vpop.xlane.xlu2 %75 }
  0x91   :  { %v98_v22 = vpop.xlane.xlu1 %97  ;;  %v104_v34 = vadd.f32 %v103_v30, %v76_v23 }
  0x92   :  { %v96_v24 = vpop.xlane.xlu0 %95 }
  0x93   :  { %v130_v48 = vadd.f32 %v98_v22, %v96_v24 }
  0x98   :  { %v100_v26 = vpop.xlane.xlu2 %99 }
  0x99   :  { %v92_v25 = vpop.xlane.xlu1 %91  ;;  %v131_v55 = vadd.f32 %v130_v48, %v100_v26 }
  0x9a   :  { %v84_v27 = vpop.xlane.xlu0 %83  ;;  %v122_v32 = vadd.f32 %v121_v28, %v92_v25 }
  0x9b   :  { %v113_v33 = vadd.f32 %v112_v29, %v84_v27 }
  0xa0   :  { %v94_v36 = vpop.xlane.xlu2 %93 }
  0xa1   :  { %v86_v35 = vpop.xlane.xlu1 %85  ;;  %v123_v38 = vadd.f32 %v122_v32, %v94_v36 }
  0xa2   :  { %v114_v37 = vadd.f32 %v113_v33, %v86_v35  ;;  %v78_v39 = vpop.xlane.xlu0 %77 }
  0xa3   :  { %v105_v41 = vadd.f32 %v104_v34, %v78_v39  ;;  %v124_v43 = vrot.slane %v123_v38, 4 }
  0xa4   :  { %v115_v42 = vrot.slane %v114_v37, 4 }
  0xa5   :  { %v106_v44 = vrot.slane %v105_v41, 4  ;;  %v125_v47 = vadd.f32 %v124_v43, %v123_v38 }
  0xa6   :  { %v116_v46 = vadd.f32 %v115_v42, %v114_v37 }
  0xa7   :  { %v107_v51 = vadd.f32 %v106_v44, %v105_v41  ;;  %v126_v54 = vrot.slane %v125_v47, 2 }
  0xa8   :  { %v117_v53 = vrot.slane %v116_v46, 2 }
  0xa9   :  { %v108_v57 = vrot.slane %v107_v51, 2  ;;  %v127_v59 = vadd.f32 %v126_v54, %v125_v47 }
  0xaa   :  { %v118_v58 = vadd.f32 %v117_v53, %v116_v46  ;;  %v102_v60 = vpop.xlane.xlu0 %101 }
  0xab   :  { %v109_v61 = vadd.f32 %v108_v57, %v107_v51  ;;  %v132_v62 = vadd.f32 %v131_v55, %v102_v60  ;;  %v128_v16 = vrot.slane %v127_v59, 1 }
  0xac   :  { %v119_v63 = vrot.slane %v118_v58, 1 }
  0xad   :  { %v110_v18 = vrot.slane %v109_v61, 1  ;;  %v133_v19 = vrot.slane %v132_v62, 4  ;;  %v129_v22 = vadd.f32 %v128_v16, %v127_v59 }
  0xae   :  { %v120_v21 = vadd.f32 %v119_v63, %v118_v58 }
  0xaf   :  { %v134_v24 = vadd.f32 %v133_v19, %v132_v62  ;;  %v141_v27 = vmul.f32 0.00024414063, %v129_v22  ;;  %v111_v28 = vadd.f32 %v110_v18, %v109_v61 }
  0xb0   :  { %v140_v26 = vmul.f32 0.00024414063, %v120_v21 }
  0xb1   :  { %v135_v29 = vrot.slane %v134_v24, 2  ;;  %v159_v34 = vsel %vm352_vm8, %v141_v27, %v303_v0  ;;  %v139_v35 = vmul.f32 0.00024414063, %v111_v28 }
  0xb2   :  { %v155_v30 = vsel %vm352_vm8, %v140_v26, %v305_v1  ;;  %v156_v31 = vsel %vm356_vm9, %v140_v26, %v314_v4  ;;  %v157_v32 = vsel %vm360_vm10, %v140_v26, %v334_v11  ;;  %v158_v33 = vsel %vm364_vm11, %v140_v26, %v339_v12  ;;  %175 = vst [vmem:[#allocation7 + $0x40] sm:$0xff] %v159_v34 }
  0xb3   :  { %171 = vst [vmem:[#allocation7 + $0x20] sm:$0xff] %v155_v30  ;;  %v160_v1 = vsel %vm356_vm9, %v141_v27, %v312_v3  ;;  %v136_v4 = vadd.f32 %v135_v29, %v134_v24  ;;  %v161_v11 = vsel %vm360_vm10, %v141_v27, %v330_v9  ;;  %v162_v12 = vsel %vm364_vm11, %v141_v27, %v341_v13 }
  0xb4   :  { %172 = vst [vmem:[#allocation7 + $0x28] sm:$0xff] %v156_v31  ;;  %v151_v0 = vsel %vm352_vm8, %v139_v35, %v307_v2  ;;  %v152_v3 = vsel %vm356_vm9, %v139_v35, %v316_v5  ;;  %v153_v9 = vsel %vm360_vm10, %v139_v35, %v323_v7  ;;  %v154_v13 = vsel %vm364_vm11, %v139_v35, %v343_v14 }
  0xb5   :  { %173 = vst [vmem:[#allocation7 + $0x30] sm:$0xff] %v157_v32  ;;  %v137_v36 = vrot.slane %v136_v4, 1 }
  0xb6   :  { %174 = vst [vmem:[#allocation7 + $0x38] sm:$0xff] %v158_v33 }
  0xb7   :  { %176 = vst [vmem:[#allocation7 + $0x48] sm:$0xff] %v160_v1  ;;  %v138_v37 = vadd.f32 %v137_v36, %v136_v4 }
  0xb8   :  { %177 = vst [vmem:[#allocation7 + $0x50] sm:$0xff] %v161_v11 }
  0xb9   :  { %178 = vst [vmem:[#allocation7 + $0x58] sm:$0xff] %v162_v12  ;;  %v142_v38 = vmul.f32 0.00024414063, %v138_v37 }
  0xba   :  { %167 = vst [vmem:[#allocation7] sm:$0xff] %v151_v0 }
  0xbb   :  { %168 = vst [vmem:[#allocation7 + $0x8] sm:$0xff] %v152_v3  ;;  %v163_v2 = vsel %vm352_vm8, %v142_v38, %v325_v8  ;;  %v164_v5 = vsel %vm356_vm9, %v142_v38, %v321_v6  ;;  %v165_v7 = vsel %vm360_vm10, %v142_v38, %v332_v10  ;;  %v166_v14 = vsel %vm364_vm11, %v142_v38, %v348_v15 }
  0xbc   :  { %169 = vst [vmem:[#allocation7 + $0x10] sm:$0xff] %v153_v9 }
  0xbd   :  { %170 = vst [vmem:[#allocation7 + $0x18] sm:$0xff] %v154_v13 }
  0xbe   :  { %179 = vst [vmem:[#allocation7 + $0x60] sm:$0xff] %v163_v2 }
  0xbf   :  { %180 = vst [vmem:[#allocation7 + $0x68] sm:$0xff] %v164_v5 }
  0xc0   :  { %181 = vst [vmem:[#allocation7 + $0x70] sm:$0xff] %v165_v7 }
  0xc1   :  { %182 = vst [vmem:[#allocation7 + $0x78] sm:$0xff] %v166_v14 }
  0xc2   :  { %195 = dma.vmem_to_hbm [thread:$0]  %s188_s21, 2048, %s190_s24, [#allocation6], %s276_s18, %s276_s18, %s277_s19  }
  0xc3   :  { %272 = dma.done.wait [#allocation6], 2048  }
  0xc4   :  { %273 = vsyncadd [#allocation6], 4294965248 }
  0xc5   :  { %200 = vsyncpa [#allocation5], 1 }
  0xc6   :  { %201 = vsyncpa [#allocation6], 1 }

</bundles_post_ra>
